<compile_context>
chip_gen: v5e
topology: v5e:2x2
jax: 0.10.0
libtpu: 0.0.40
codegen_flags: <defaults>
</compile_context>

<pallas_src>
import math

import numpy as np

import jax
import jax.numpy as jnp
from jax.experimental import pallas as pl
from jax.experimental.pallas import tpu as pltpu


def _round_up(x, m):
    return ((x + m - 1) // m) * m


def _pick_divisor_tile(dim, cap):
    """Largest multiple-of-128 divisor of `dim` (itself a multiple of 128) <= cap."""
    best = 128
    t = 128
    while t <= min(dim, cap):
        if dim % t == 0:
            best = t
        t += 128
    return best


def _vmem_limit_bytes():
    """Generation-aware scoped-VMEM limit: ~48 MiB on v7x, ~96 MiB on v5e/v6e."""
    cap = 64 * 1024 * 1024
    try:
        cap = int(getattr(pltpu.get_tpu_info(), "vmem_capacity_bytes", cap))
    except Exception:
        pass
    return min(cap * 3 // 4, 96 * 1024 * 1024)


def _choose_row_tile(num_nodes):
    """Row tile (multiple of 128) and padded node count; >= 2 row tiles when possible."""
    np_min = _round_up(max(num_nodes, 8), 128)
    if np_min >= 256:
        tile = min(512, _round_up((np_min + 1) // 2, 128))
    else:
        tile = np_min
    return tile, _round_up(num_nodes, tile)


# ---------------------------------------------------------------------------
# Kernels
# ---------------------------------------------------------------------------

def _feature_mm_kernel(x_ref, w_ref, b_ref, o_ref, acc_ref):
    """o[i, j] = sum_k x[i, k] @ w[k, j] + b[j]; f32 accumulation, cast on store."""
    k = pl.program_id(2)

    @pl.when(k == 0)
    def _():
        acc_ref[...] = jnp.zeros_like(acc_ref)

    acc_ref[...] += jnp.dot(x_ref[...], w_ref[...],
                            preferred_element_type=jnp.float32)

    @pl.when(k == pl.num_programs(2) - 1)
    def _():
        o_ref[...] = (acc_ref[...] + b_ref[...]).astype(o_ref.dtype)


def _make_adjacency_kernel(tile, s_resident):
    """Block-sparse A @ S + b: one grid step per non-empty (tile x tile) A block."""

    def kernel(brow_ref, bcol_ref, a_ref, s_ref, bias_ref, o_ref):
        b = pl.program_id(0)
        nb = pl.num_programs(0)
        row = brow_ref[b]
        # First / last block of this output row tile (schedule is sorted by row).
        first = jnp.logical_or(b == 0, brow_ref[jnp.maximum(b - 1, 0)] != row)
        last = jnp.logical_or(b == nb - 1,
                              brow_ref[jnp.minimum(b + 1, nb - 1)] != row)

        @pl.when(first)
        def _():
            o_ref[...] = jnp.zeros_like(o_ref)

        if s_resident:
            k_off = pl.multiple_of(bcol_ref[b] * tile, tile)
            s_blk = s_ref[pl.ds(k_off, tile), :]
        else:
            s_blk = s_ref[...]

        # Accumulate directly into the f32 output block (VMEM-resident across the
        # consecutive schedule entries of this row); no scratch accumulator needed.
        o_ref[...] += jnp.dot(a_ref[...], s_blk,
                              preferred_element_type=jnp.float32)

        @pl.when(last)
        def _():
            o_ref[...] += bias_ref[...]

    return kernel


# ---------------------------------------------------------------------------
# pallas_call wrappers
# ---------------------------------------------------------------------------

def _feature_matmul(x, w, bias2d, *, row_tile, out_dtype):
    """out = x @ w + bias; x: (Np, Kp), w: (Kp, Fp), bias2d: (1, Fp). Fully tiled."""
    Np, Kp = x.shape
    Fp = w.shape[1]
    tn = _pick_divisor_tile(Fp, 512)
    tk = _pick_divisor_tile(Kp, 512)
    vmem_limit = _vmem_limit_bytes()

    flops = 2 * Np * Kp * Fp
    bytes_acc = (Np * Kp * jnp.dtype(x.dtype).itemsize
                 + Kp * Fp * jnp.dtype(w.dtype).itemsize
                 + Fp * 4 + Np * Fp * jnp.dtype(out_dtype).itemsize)

    return pl.pallas_call(
        _feature_mm_kernel,
        out_shape=jax.ShapeDtypeStruct((Np, Fp), out_dtype),
        grid_spec=pltpu.PrefetchScalarGridSpec(
            num_scalar_prefetch=0,
            grid=(Np // row_tile, Fp // tn, Kp // tk),
            in_specs=[
                pl.BlockSpec((row_tile, tk), lambda i, j, k: (i, k)),
                pl.BlockSpec((tk, tn), lambda i, j, k: (k, j)),
                pl.BlockSpec((1, tn), lambda i, j, k: (0, j)),
            ],
            out_specs=pl.BlockSpec((row_tile, tn), lambda i, j, k: (i, j)),
            scratch_shapes=[pltpu.VMEM((row_tile, tn), jnp.float32)],
        ),
        compiler_params=pltpu.CompilerParams(
            dimension_semantics=("parallel", "parallel", "arbitrary"),
            vmem_limit_bytes=vmem_limit,
        ),
        cost_estimate=pl.CostEstimate(flops=int(flops), transcendentals=0,
                                      bytes_accessed=int(bytes_acc)),
    )(x, w, bias2d)


def _adjacency_matmul(adj, s, bias2d, block_rows, block_cols, *, tile):
    """out = A @ s + bias, streaming only the non-empty (tile x tile) blocks of A.

    adj: (Np, Np) compute dtype; s: (Np, Fp) compute dtype; bias2d: (1, Fp) f32.
    block_rows / block_cols: int32 schedule sorted by row, >= 1 entry per row tile.
    """
    Np = adj.shape[0]
    Fp = s.shape[1]
    num_blocks = int(block_rows.shape[0])
    a_item = jnp.dtype(adj.dtype).itemsize
    s_item = jnp.dtype(s.dtype).itemsize
    vmem_limit = _vmem_limit_bytes()

    # VMEM budget: 3 A buffers + 2 output buffers + bias; keep S resident if 2x its
    # size (conservative double-buffer allowance) still fits under the limit.
    fixed = 3 * tile * tile * a_item + 2 * tile * Fp * 4 + 2 * Fp * 4
    s_resident = fixed + 2 * Np * Fp * s_item <= int(vmem_limit * 0.8)

    if s_resident:
        s_spec = pl.BlockSpec((Np, Fp), lambda b, br, bc: (0, 0))
    else:
        s_spec = pl.BlockSpec((tile, Fp), lambda b, br, bc: (bc[b], 0))

    flops = 2 * num_blocks * tile * tile * Fp
    s_bytes = (Np if s_resident else num_blocks * tile) * Fp * s_item
    bytes_acc = num_blocks * tile * tile * a_item + s_bytes + Np * Fp * 4 + Fp * 4

    return pl.pallas_call(
        _make_adjacency_kernel(tile, s_resident),
        out_shape=jax.ShapeDtypeStruct((Np, Fp), jnp.float32),
        grid_spec=pltpu.PrefetchScalarGridSpec(
            num_scalar_prefetch=2,
            grid=(num_blocks,),
            in_specs=[
                pl.BlockSpec((tile, tile), lambda b, br, bc: (br[b], bc[b]),
                             pipeline_mode=pl.Buffered(3)),
                s_spec,
                pl.BlockSpec((1, Fp), lambda b, br, bc: (0, 0)),
            ],
            out_specs=pl.BlockSpec((tile, Fp), lambda b, br, bc: (br[b], 0)),
        ),
        compiler_params=pltpu.CompilerParams(
            dimension_semantics=("arbitrary",),
            vmem_limit_bytes=vmem_limit,
        ),
        cost_estimate=pl.CostEstimate(flops=int(flops), transcendentals=0,
                                      bytes_accessed=int(bytes_acc)),
    )(block_rows, block_cols, adj, s, bias2d)


# ---------------------------------------------------------------------------
# Adjacency construction (graph preprocessing; edge_index must be concrete)
# ---------------------------------------------------------------------------

def build_padded_adjacency(edge_index, edge_attr, num_nodes, *, tile, padded_nodes,
                           compute_dtype):
    """Dense (Np, Np) adjacency in compute_dtype + non-empty-block schedule.

    A[row, col] += edge_attr (duplicates summed, like torch.sparse spmm).
    """
    ei = np.asarray(jax.device_get(edge_index)).astype(np.int64)
    rows, cols = ei[0], ei[1]
    if edge_attr is None:
        edge_attr = jnp.ones((rows.shape[0],), dtype=jnp.float32)

    adj = jnp.zeros((padded_nodes, padded_nodes), dtype=compute_dtype)
    adj = adj.at[jnp.asarray(rows), jnp.asarray(cols)].add(
        edge_attr.astype(compute_dtype))

    n_tiles = padded_nodes // tile
    occupied = np.zeros((n_tiles, n_tiles), dtype=bool)
    if rows.size:
        occupied[rows // tile, cols // tile] = True
    block_rows, block_cols = [], []
    for i in range(n_tiles):
        ks = np.nonzero(occupied[i])[0]
        if ks.size == 0:
            # Keep one (all-zero) block so this output row tile is still
            # initialized and receives its bias.
            ks = np.zeros((1,), dtype=np.int64)
        block_rows.append(np.full((ks.size,), i, dtype=np.int32))
        block_cols.append(ks.astype(np.int32))
    block_rows = jnp.asarray(np.concatenate(block_rows))
    block_cols = jnp.asarray(np.concatenate(block_cols))
    return adj, block_rows, block_cols


# ---------------------------------------------------------------------------
# GCN layer forward
# ---------------------------------------------------------------------------

def graph_convolution(x, edge_index, edge_attr=None, *, weight, bias=None,
                      compute_dtype=jnp.bfloat16):
    """GCN forward: A @ (x @ W) + b  (association chosen by min(F_in, F_out)).

    x: (N, F_in) f32; edge_index: (2, E) int (concrete, graph preprocessing);
    edge_attr: (E,) f32 or None; weight: (F_in, F_out) f32; bias: (F_out,) or None.
    compute_dtype is the MXU input dtype of the N x N adjacency stream
    (bf16 default for ~2x less HBM traffic; accumulation is always f32).
    """
    N, F_in = x.shape
    F_out = weight.shape[1]
    if bias is None:
        bias = jnp.zeros((F_out,), dtype=jnp.float32)

    tile, Np = _choose_row_tile(N)
    adj, block_rows, block_cols = build_padded_adjacency(
        edge_index, edge_attr, N, tile=tile, padded_nodes=Np,
        compute_dtype=compute_dtype)

    Kp = _round_up(F_in, 128)
    Fp = _round_up(F_out, 128)
    w_pad = jnp.zeros((Kp, Fp), jnp.float32).at[:F_in, :F_out].set(weight)
    b_pad = jnp.zeros((1, Fp), jnp.float32).at[0, :F_out].set(bias)

    if F_out <= F_in:
        # out = A @ (x @ W) + b : the N x N matmul's output width is F_out.
        x_pad = jnp.zeros((Np, Kp), jnp.float32).at[:N, :F_in].set(x)
        zero_b = jnp.zeros((1, Fp), jnp.float32)
        support = _feature_matmul(x_pad, w_pad, zero_b, row_tile=tile,
                                  out_dtype=compute_dtype)            # (Np, Fp)
        out = _adjacency_matmul(adj, support, b_pad, block_rows, block_cols,
                                tile=tile)                            # (Np, Fp) f32
    else:
        # out = (A @ x) @ W + b : the N x N matmul's output width is F_in.
        x_pad = jnp.zeros((Np, Kp), compute_dtype).at[:N, :F_in].set(
            x.astype(compute_dtype))
        zero_b = jnp.zeros((1, Kp), jnp.float32)
        h = _adjacency_matmul(adj, x_pad, zero_b, block_rows, block_cols,
                              tile=tile)                              # (Np, Kp) f32
        out = _feature_matmul(h, w_pad, b_pad, row_tile=tile,
                              out_dtype=jnp.float32)                  # (Np, Fp)

    # Padded rows contain only bias; keep the slice.
    return out[:N, :F_out]


if __name__ == "__main__":
    key = jax.random.PRNGKey(0)
    k_x, k_w, k_src, k_dst = jax.random.split(key, 4)

    # Small shapes consistent with the module: N nodes, in_features -> out_features.
    N = 64
    in_features = 32
    out_features = 16
    num_edges = 256

    x = jax.random.normal(k_x, (N, in_features), dtype=jnp.float32)

    # Parameters, initialized like reset_parameters(): W ~ U(-stdv, stdv), bias = 0.
    stdv = 1.0 / math.sqrt(out_features)
    weight = jax.random.uniform(k_w, (in_features, out_features), dtype=jnp.float32,
                                minval=-stdv, maxval=stdv)
    bias = jnp.zeros((out_features,), dtype=jnp.float32)

    # Random graph edge_index (2, E); edge_attr defaults to ones (as in forward).
    src = jax.random.randint(k_src, (num_edges,), 0, N)
    dst = jax.random.randint(k_dst, (num_edges,), 0, N)
    edge_index = jnp.stack([src, dst], axis=0)
    edge_attr = jnp.ones((num_edges,), dtype=jnp.float32)

    # Pure-JAX reference: dense A with duplicates summed, out = A @ (x @ W) + b.
    adj_ref = jnp.zeros((N, N), jnp.float32).at[src, dst].add(edge_attr)
    ref = adj_ref @ (x @ weight) + bias[None, :]

    # f32 adjacency stream (strict check).
    out_f32 = graph_convolution(x, edge_index, edge_attr, weight=weight, bias=bias,
                                compute_dtype=jnp.float32)
    out_f32 = jax.block_until_ready(out_f32)
    assert out_f32.shape == (N, out_features)
    assert jnp.allclose(out_f32, ref, atol=1e-4, rtol=1e-4), "f32 mismatch vs reference"

    # Default bf16 adjacency stream (f32 accumulation) — recommended on v5e/v6e/v7x.
    out_bf16 = graph_convolution(x, edge_index, edge_attr, weight=weight, bias=bias)
    out_bf16 = jax.block_until_ready(out_bf16)
    assert jnp.allclose(out_bf16, ref, atol=5e-2, rtol=5e-2), "bf16 mismatch vs reference"

    # Exercise the (A @ x) @ W association branch (F_out > F_in).
    weight_wide = jax.random.uniform(jax.random.PRNGKey(1), (in_features, 48),
                                     dtype=jnp.float32, minval=-stdv, maxval=stdv)
    bias_wide = jnp.zeros((48,), dtype=jnp.float32)
    out_wide = graph_convolution(x, edge_index, edge_attr, weight=weight_wide,
                                 bias=bias_wide, compute_dtype=jnp.float32)
    out_wide = jax.block_until_ready(out_wide)
    ref_wide = adj_ref @ (x @ weight_wide) + bias_wide[None, :]
    assert jnp.allclose(out_wide, ref_wide, atol=1e-4, rtol=1e-4), "wide-F_out mismatch"

    print("KERNEL_OK")
</pallas_src>

<mosaic_0001>
module attributes {stable_mosaic.version = 11 : i64} {
  func.func @_feature_mm_kernel(%arg0: i32, %arg1: i32, %arg2: i32, %arg3: memref<128x128xf32, #tpu.memory_space<vmem>>, %arg4: memref<128x128xf32, #tpu.memory_space<vmem>>, %arg5: memref<1x128xf32, #tpu.memory_space<vmem>>, %arg6: memref<128x128xf32, #tpu.memory_space<vmem>>, %arg7: memref<128x128xf32, #tpu.memory_space<vmem>>) attributes {dimension_semantics = [#tpu.dimension_semantics<parallel>, #tpu.dimension_semantics<parallel>, #tpu.dimension_semantics<arbitrary>], iteration_bounds = array<i64: 1, 1, 1>, scalar_prefetch = 0 : i64, scratch_operands = 1 : i64, tpu.core_type = #tpu.core_type<tc>, window_params = [{transform_indices = @transform_0, window_bounds = array<i64: 128, 128>}, {transform_indices = @transform_1, window_bounds = array<i64: 128, 128>}, {transform_indices = @transform_2, window_bounds = array<i64: 1, 128>}, {transform_indices = @transform_3, window_bounds = array<i64: 128, 128>}]} {
    %c0_i32 = arith.constant 0 : i32
    %0 = arith.cmpi eq, %arg2, %c0_i32 : i32
    %1 = arith.extui %0 : i1 to i32
    %c0_i32_0 = arith.constant 0 : i32
    %2 = arith.cmpi ne, %1, %c0_i32_0 : i32
    scf.if %2 {
      %cst_10 = arith.constant 0.000000e+00 : f32
      %12 = vector.broadcast %cst_10 : f32 to vector<128x128xf32>
      %c0_11 = arith.constant 0 : index
      %c0_12 = arith.constant 0 : index
      %13 = vector.load %arg7[%c0_11, %c0_12] : memref<128x128xf32, #tpu.memory_space<vmem>>, vector<128x128xf32>
      tpu.vector_store %arg7[%c0_11, %c0_12], %12 {strides = array<i32>} : memref<128x128xf32, #tpu.memory_space<vmem>>, vector<128x128xf32>,
    } else {
    }
    %c0 = arith.constant 0 : index
    %c0_1 = arith.constant 0 : index
    %3 = vector.load %arg7[%c0, %c0_1] : memref<128x128xf32, #tpu.memory_space<vmem>>, vector<128x128xf32>
    %c0_2 = arith.constant 0 : index
    %c0_3 = arith.constant 0 : index
    %4 = vector.load %arg3[%c0_2, %c0_3] : memref<128x128xf32, #tpu.memory_space<vmem>>, vector<128x128xf32>
    %c0_4 = arith.constant 0 : index
    %c0_5 = arith.constant 0 : index
    %5 = vector.load %arg4[%c0_4, %c0_5] : memref<128x128xf32, #tpu.memory_space<vmem>>, vector<128x128xf32>
    %cst = arith.constant dense<0.000000e+00> : vector<128x128xf32>
    %6 = tpu.matmul %4, %5, %cst {dimension_numbers = #tpu.dot_dimension_numbers<[1], [0], [0], [1], [0, 0, 1, 1], [], []>} : vector<128x128xf32>, vector<128x128xf32>, vector<128x128xf32> -> vector<128x128xf32>
    %7 = arith.addf %3, %6 : vector<128x128xf32>
    %c0_6 = arith.constant 0 : index
    %c0_7 = arith.constant 0 : index
    %8 = vector.load %arg7[%c0_6, %c0_7] : memref<128x128xf32, #tpu.memory_space<vmem>>, vector<128x128xf32>
    tpu.vector_store %arg7[%c0_6, %c0_7], %7 {strides = array<i32>} : memref<128x128xf32, #tpu.memory_space<vmem>>, vector<128x128xf32>,
    %c0_i32_8 = arith.constant 0 : i32
    %9 = arith.cmpi eq, %arg2, %c0_i32_8 : i32
    %10 = arith.extui %9 : i1 to i32
    %c0_i32_9 = arith.constant 0 : i32
    %11 = arith.cmpi ne, %10, %c0_i32_9 : i32
    scf.if %11 {
      %c0_10 = arith.constant 0 : index
      %c0_11 = arith.constant 0 : index
      %12 = vector.load %arg7[%c0_10, %c0_11] : memref<128x128xf32, #tpu.memory_space<vmem>>, vector<128x128xf32>
      %c0_12 = arith.constant 0 : index
      %c0_13 = arith.constant 0 : index
      %13 = vector.load %arg5[%c0_12, %c0_13] : memref<1x128xf32, #tpu.memory_space<vmem>>, vector<1x128xf32>
      %14 = vector.broadcast %13 : vector<1x128xf32> to vector<128x128xf32>
      %15 = arith.addf %12, %14 : vector<128x128xf32>
      %c0_14 = arith.constant 0 : index
      %c0_15 = arith.constant 0 : index
      %16 = vector.load %arg6[%c0_14, %c0_15] : memref<128x128xf32, #tpu.memory_space<vmem>>, vector<128x128xf32>
      tpu.vector_store %arg6[%c0_14, %c0_15], %15 {strides = array<i32>} : memref<128x128xf32, #tpu.memory_space<vmem>>, vector<128x128xf32>,
    } else {
    }
    return
  }
  func.func @transform_0(%arg0: i32, %arg1: i32, %arg2: i32) -> (i32, i32) {
    %c0_i32 = arith.constant 0 : i32
    return %arg0, %arg2 : i32, i32
  }
  func.func @transform_1(%arg0: i32, %arg1: i32, %arg2: i32) -> (i32, i32) {
    %c0_i32 = arith.constant 0 : i32
    return %arg2, %arg1 : i32, i32
  }
  func.func @transform_2(%arg0: i32, %arg1: i32, %arg2: i32) -> (i32, i32) {
    %c0_i32 = arith.constant 0 : i32
    %c0_i32_0 = arith.constant 0 : i32
    return %c0_i32, %arg1 : i32, i32
  }
  func.func @transform_3(%arg0: i32, %arg1: i32, %arg2: i32) -> (i32, i32) {
    %c0_i32 = arith.constant 0 : i32
    return %arg0, %arg1 : i32, i32
  }
}

</mosaic_0001>

<bundles_post_ra>
// kernel: tpu_custom_call.1
= control target key start
LH: loop header
LB: loop body
LE: loop exit
PB: predicated region body
PF: predicated region fallthrough
CT: control target
= control target key end

     0   :  { %8 = vsyncpa [#allocation4], 0  ;;  %s465_s0 = inlined_call_operand.hbm [shape: f32[128,128], index: 0, kind: input, shape index: {}]   ;;  %s466_s1 = inlined_call_operand.hbm [shape: f32[128,128], index: 1, kind: input, shape index: {}]   ;;  %s467_s2 = inlined_call_operand.vmem [shape: f32[1,128], index: 2, kind: input, shape index: {}]   ;;  %s468_s3 = inlined_call_operand.hbm [shape: f32[128,128], index: 3, kind: output, shape index: {}]  }
   0x1   :  { %9 = vsyncpa [#allocation7], 0 }
   0x2   :  { %10 = vsyncpa [#allocation5], 0  ;;  %s15_s14 = sshll.u32 %s465_s0, 4  ;;  %s419_s15 = smov [#allocation3]   ;;  %s16_s14 = int_to_ptr.hbm [resolvable:$true] %s15_s14 }
   0x3   :  { %s17_s16 = sshll.u32 %s419_s15, 4  ;;  %s28_s19 = sshll.u32 %s466_s1, 4  ;;  %s18_s16 = int_to_ptr.vmem [resolvable:$true] %s17_s16  ;;  %s29_s19 = int_to_ptr.hbm [resolvable:$true] %s28_s19 }
   0x4   :  { %s420_s20 = smov 128   ;;  %s421_s21 = smov 8  }
   0x5   :  { %23 = dma.hbm_to_vmem [thread:$0]  %s16_s14, 2048, %s18_s16, [#allocation4], %s420_s20, %s420_s20, %s421_s21  }
   0x6   :  { %s422_s22 = smov [#allocation6]  }
   0x7   :  { %s30_s23 = sshll.u32 %s422_s22, 4  ;;  %s31_s23 = int_to_ptr.vmem [resolvable:$true] %s30_s23 }
   0x8   :  { %36 = dma.hbm_to_vmem [thread:$0]  %s29_s19, 2048, %s31_s23, [#allocation7], %s420_s20, %s420_s20, %s421_s21  }
   0x9   :  { %413 = dma.done.wait [#allocation4], 2048  }
   0xa   :  { %414 = vsyncadd [#allocation4], 4294965248 }
   0xb   :  { %415 = dma.done.wait [#allocation7], 2048  }
   0xc   :  { %416 = vsyncadd [#allocation7], 4294965248  ;;  %v114_v0 = vld [vmem:[#allocation6 + $0x78] sm:$0xff]  ;;  %v113_v1 = vld [vmem:[#allocation6 + $0x70] sm:$0xff]  ;;  %s273_s27 = sshll.u32 %s468_s3, 4  ;;  %s274_s27 = int_to_ptr.hbm [resolvable:$true] %s273_s27 }
   0xd   :  { %288 = vmatpush.msra.mxu2 %v114_v0  ;;  %289 = vmatpush.msra.mxu3 %v114_v0  ;;  %v112_v2 = vld [vmem:[#allocation6 + $0x68] sm:$0xff]  ;;  %v111_v3 = vld [vmem:[#allocation6 + $0x60] sm:$0xff]  ;;  %v110_v4 = vld [vmem:[#allocation6 + $0x58] sm:$0xff] }
   0xe   :  { %115 = vmatpush.msra.mxu0 %v114_v0  ;;  %287 = vmatpush.msra.mxu1 %v114_v0  ;;  %v109_v5 = vld [vmem:[#allocation6 + $0x50] sm:$0xff]  ;;  %v108_v6 = vld [vmem:[#allocation6 + $0x48] sm:$0xff]  ;;  %v107_v7 = vld [vmem:[#allocation6 + $0x40] sm:$0xff] }
   0xf   :  { %291 = vmatpush.msra.mxu2 %v113_v1  ;;  %292 = vmatpush.msra.mxu3 %v113_v1  ;;  %v106_v8 = vld [vmem:[#allocation6 + $0x38] sm:$0xff]  ;;  %v105_v9 = vld [vmem:[#allocation6 + $0x30] sm:$0xff]  ;;  %v104_v10 = vld [vmem:[#allocation6 + $0x28] sm:$0xff] }
  0x10   :  { %116 = vmatpush.msra.mxu0 %v113_v1  ;;  %290 = vmatpush.msra.mxu1 %v113_v1  ;;  %v103_v11 = vld [vmem:[#allocation6 + $0x20] sm:$0xff]  ;;  %v102_v12 = vld [vmem:[#allocation6 + $0x18] sm:$0xff]  ;;  %v101_v13 = vld [vmem:[#allocation6 + $0x10] sm:$0xff] }
  0x11   :  { %294 = vmatpush.msra.mxu2 %v112_v2  ;;  %295 = vmatpush.msra.mxu3 %v112_v2  ;;  %v100_v14 = vld [vmem:[#allocation6 + $0x8] sm:$0xff]  ;;  %v99_v15 = vld [vmem:[#allocation6] sm:$0xff]  ;;  %v93_v24 = vld [vmem:[#allocation3 + $0x50] sm:$0xff] }
  0x12   :  { %117 = vmatpush.msra.mxu0 %v112_v2  ;;  %293 = vmatpush.msra.mxu1 %v112_v2  ;;  %v91_v16 = vld [vmem:[#allocation3 + $0x40] sm:$0xff]  ;;  %v92_v20 = vld [vmem:[#allocation3 + $0x48] sm:$0xff]  ;;  %v97_v25 = vld [vmem:[#allocation3 + $0x70] sm:$0xff] }
  0x13   :  { %297 = vmatpush.msra.mxu2 %v111_v3  ;;  %298 = vmatpush.msra.mxu3 %v111_v3  ;;  %v95_v17 = vld [vmem:[#allocation3 + $0x60] sm:$0xff]  ;;  %v96_v21 = vld [vmem:[#allocation3 + $0x68] sm:$0xff]  ;;  %v85_v26 = vld [vmem:[#allocation3 + $0x10] sm:$0xff] }
  0x14   :  { %118 = vmatpush.msra.mxu0 %v111_v3  ;;  %296 = vmatpush.msra.mxu1 %v111_v3  ;;  %v83_v18 = vld [vmem:[#allocation3] sm:$0xff]  ;;  %v84_v22 = vld [vmem:[#allocation3 + $0x8] sm:$0xff]  ;;  %v89_v27 = vld [vmem:[#allocation3 + $0x30] sm:$0xff] }
  0x15   :  { %300 = vmatpush.msra.mxu2 %v110_v4  ;;  %301 = vmatpush.msra.mxu3 %v110_v4  ;;  %v87_v19 = vld [vmem:[#allocation3 + $0x20] sm:$0xff]  ;;  %v88_v23 = vld [vmem:[#allocation3 + $0x28] sm:$0xff]  ;;  %v94_v28 = vld [vmem:[#allocation3 + $0x58] sm:$0xff] }
  0x16   :  { %119 = vmatpush.msra.mxu0 %v110_v4  ;;  %299 = vmatpush.msra.mxu1 %v110_v4  ;;  %v98_v29 = vld [vmem:[#allocation3 + $0x78] sm:$0xff]  ;;  %v340_v32 = vld [vmem:[%s467_s2] ss:$0 sm:$0xff]  ;;  %s423_s2 = smov [#allocation8]  }
  0x17   :  { %303 = vmatpush.msra.mxu2 %v109_v5  ;;  %304 = vmatpush.msra.mxu3 %v109_v5  ;;  %v86_v30 = vld [vmem:[#allocation3 + $0x18] sm:$0xff]  ;;  %s271_s24 = sshll.u32 %s423_s2, 4  ;;  %s272_s24 = int_to_ptr.vmem [resolvable:$true] %s271_s24 }
  0x18   :  { %120 = vmatpush.msra.mxu0 %v109_v5  ;;  %302 = vmatpush.msra.mxu1 %v109_v5  ;;  %v90_v31 = vld [vmem:[#allocation3 + $0x38] sm:$0xff] }
  0x19   :  { %306 = vmatpush.msra.mxu2 %v108_v6  ;;  %307 = vmatpush.msra.mxu3 %v108_v6 }
  0x1a   :  { %121 = vmatpush.msra.mxu0 %v108_v6  ;;  %305 = vmatpush.msra.mxu1 %v108_v6 }
  0x1b   :  { %309 = vmatpush.msra.mxu2 %v107_v7  ;;  %310 = vmatpush.msra.mxu3 %v107_v7 }
  0x1c   :  { %122 = vmatpush.msra.mxu0 %v107_v7  ;;  %308 = vmatpush.msra.mxu1 %v107_v7 }
  0x1d   :  { %312 = vmatpush.msra.mxu2 %v106_v8  ;;  %313 = vmatpush.msra.mxu3 %v106_v8 }
  0x1e   :  { %123 = vmatpush.msra.mxu0 %v106_v8  ;;  %311 = vmatpush.msra.mxu1 %v106_v8 }
  0x1f   :  { %315 = vmatpush.msra.mxu2 %v105_v9  ;;  %316 = vmatpush.msra.mxu3 %v105_v9 }
  0x20   :  { %124 = vmatpush.msra.mxu0 %v105_v9  ;;  %314 = vmatpush.msra.mxu1 %v105_v9 }
  0x21   :  { %318 = vmatpush.msra.mxu2 %v104_v10  ;;  %319 = vmatpush.msra.mxu3 %v104_v10 }
  0x22   :  { %125 = vmatpush.msra.mxu0 %v104_v10  ;;  %317 = vmatpush.msra.mxu1 %v104_v10 }
  0x23   :  { %321 = vmatpush.msra.mxu2 %v103_v11  ;;  %322 = vmatpush.msra.mxu3 %v103_v11 }
  0x24   :  { %126 = vmatpush.msra.mxu0 %v103_v11  ;;  %320 = vmatpush.msra.mxu1 %v103_v11 }
  0x25   :  { %324 = vmatpush.msra.mxu2 %v102_v12  ;;  %325 = vmatpush.msra.mxu3 %v102_v12 }
  0x26   :  { %127 = vmatpush.msra.mxu0 %v102_v12  ;;  %323 = vmatpush.msra.mxu1 %v102_v12 }
  0x27   :  { %327 = vmatpush.msra.mxu2 %v101_v13  ;;  %328 = vmatpush.msra.mxu3 %v101_v13 }
  0x28   :  { %128 = vmatpush.msra.mxu0 %v101_v13  ;;  %326 = vmatpush.msra.mxu1 %v101_v13 }
  0x29   :  { %330 = vmatpush.msra.mxu2 %v100_v14  ;;  %331 = vmatpush.msra.mxu3 %v100_v14 }
  0x2a   :  { %129 = vmatpush.msra.mxu0 %v100_v14  ;;  %329 = vmatpush.msra.mxu1 %v100_v14 }
  0x2b   :  { %333 = vmatpush.msra.mxu2 %v99_v15  ;;  %334 = vmatpush.msra.mxu3 %v99_v15 }
  0x2c   :  { %155 = vmatmul.f32.vlgmr.msra.gmra.mxu2 %v91_v16  ;;  %167 = vmatmul.f32.vlgmr.msra.gmra.mxu3 %v95_v17 }
  0x2d   :  { %130 = vmatpush.msra.mxu0 %v99_v15  ;;  %332 = vmatpush.msra.mxu1 %v99_v15 }
  0x2e   :  { %131 = vmatmul.f32.vlgmr.msra.gmra.mxu0 %v83_v18  ;;  %143 = vmatmul.f32.vlgmr.msra.gmra.mxu1 %v87_v19 }
  0x34   :  { %158 = vmatmul.f32.gmra.mxu2 %v92_v20  ;;  %170 = vmatmul.f32.gmra.mxu3 %v96_v21 }
  0x36   :  { %134 = vmatmul.f32.gmra.mxu0 %v84_v22  ;;  %146 = vmatmul.f32.gmra.mxu1 %v88_v23 }
  0x3c   :  { %161 = vmatmul.f32.gmra.mxu2 %v93_v24  ;;  %173 = vmatmul.f32.gmra.mxu3 %v97_v25 }
  0x3e   :  { %137 = vmatmul.f32.gmra.mxu0 %v85_v26  ;;  %149 = vmatmul.f32.gmra.mxu1 %v89_v27 }
  0x44   :  { %164 = vmatmul.f32.gmra.mxu2 %v94_v28  ;;  %176 = vmatmul.f32.gmra.mxu3 %v98_v29 }
  0x46   :  { %140 = vmatmul.f32.gmra.mxu0 %v86_v30  ;;  %152 = vmatmul.f32.gmra.mxu1 %v90_v31 }
  0xab   :  { %v132_v33 = vpop.f32.mrf.mxu0  ;;  %v144_v34 = vpop.f32.mrf.mxu1 }
  0xac   :  { %v235_v35 = vadd.f32 %v340_v32, %v132_v33  ;;  %v239_v36 = vadd.f32 %v340_v32, %v144_v34 }
  0xae   :  { %251 = vst [vmem:[#allocation8] sm:$0xff] %v235_v35 }
  0xaf   :  { %255 = vst [vmem:[#allocation8 + $0x20] sm:$0xff] %v239_v36  ;;  %v156_v37 = vpop.f32.mrf.mxu2  ;;  %v168_v38 = vpop.f32.mrf.mxu3 }
  0xb0   :  { %v243_v39 = vadd.f32 %v340_v32, %v156_v37  ;;  %v247_v40 = vadd.f32 %v340_v32, %v168_v38 }
  0xb2   :  { %259 = vst [vmem:[#allocation8 + $0x40] sm:$0xff] %v243_v39 }
  0xb3   :  { %263 = vst [vmem:[#allocation8 + $0x60] sm:$0xff] %v247_v40  ;;  %v135_v41 = vpop.f32.mrf.mxu0  ;;  %v147_v42 = vpop.f32.mrf.mxu1 }
  0xb4   :  { %v236_v43 = vadd.f32 %v340_v32, %v135_v41  ;;  %v240_v44 = vadd.f32 %v340_v32, %v147_v42 }
  0xb6   :  { %252 = vst [vmem:[#allocation8 + $0x8] sm:$0xff] %v236_v43 }
  0xb7   :  { %256 = vst [vmem:[#allocation8 + $0x28] sm:$0xff] %v240_v44  ;;  %v159_v45 = vpop.f32.mrf.mxu2  ;;  %v171_v46 = vpop.f32.mrf.mxu3 }
  0xb8   :  { %v244_v47 = vadd.f32 %v340_v32, %v159_v45  ;;  %v248_v48 = vadd.f32 %v340_v32, %v171_v46 }
  0xba   :  { %260 = vst [vmem:[#allocation8 + $0x48] sm:$0xff] %v244_v47 }
  0xbb   :  { %264 = vst [vmem:[#allocation8 + $0x68] sm:$0xff] %v248_v48  ;;  %v138_v49 = vpop.f32.mrf.mxu0  ;;  %v150_v50 = vpop.f32.mrf.mxu1 }
  0xbc   :  { %v237_v51 = vadd.f32 %v340_v32, %v138_v49  ;;  %v241_v52 = vadd.f32 %v340_v32, %v150_v50 }
  0xbe   :  { %253 = vst [vmem:[#allocation8 + $0x10] sm:$0xff] %v237_v51 }
  0xbf   :  { %257 = vst [vmem:[#allocation8 + $0x30] sm:$0xff] %v241_v52  ;;  %v162_v53 = vpop.f32.mrf.mxu2  ;;  %v174_v54 = vpop.f32.mrf.mxu3 }
  0xc0   :  { %v245_v55 = vadd.f32 %v340_v32, %v162_v53  ;;  %v249_v56 = vadd.f32 %v340_v32, %v174_v54 }
  0xc2   :  { %261 = vst [vmem:[#allocation8 + $0x50] sm:$0xff] %v245_v55 }
  0xc3   :  { %265 = vst [vmem:[#allocation8 + $0x70] sm:$0xff] %v249_v56  ;;  %v141_v57 = vpop.f32.mrf.mxu0  ;;  %v153_v58 = vpop.f32.mrf.mxu1 }
  0xc4   :  { %v238_v59 = vadd.f32 %v340_v32, %v141_v57  ;;  %v242_v60 = vadd.f32 %v340_v32, %v153_v58 }
  0xc6   :  { %254 = vst [vmem:[#allocation8 + $0x18] sm:$0xff] %v238_v59 }
  0xc7   :  { %258 = vst [vmem:[#allocation8 + $0x38] sm:$0xff] %v242_v60  ;;  %v165_v61 = vpop.f32.mrf.mxu2  ;;  %v177_v62 = vpop.f32.mrf.mxu3 }
  0xc8   :  { %v246_v63 = vadd.f32 %v340_v32, %v165_v61  ;;  %v250_v0 = vadd.f32 %v340_v32, %v177_v62 }
  0xca   :  { %262 = vst [vmem:[#allocation8 + $0x58] sm:$0xff] %v246_v63 }
  0xcb   :  { %266 = vst [vmem:[#allocation8 + $0x78] sm:$0xff] %v250_v0 }
  0xcc   :  { %279 = dma.vmem_to_hbm [thread:$0]  %s272_s24, 2048, %s274_s27, [#allocation5], %s420_s20, %s420_s20, %s421_s21  }
  0xcd   :  { %417 = dma.done.wait [#allocation5], 2048  }
  0xce   :  { %418 = vsyncadd [#allocation5], 4294965248 }
  0xcf   :  { %284 = vsyncpa [#allocation4], 1 }
  0xd0   :  { %285 = vsyncpa [#allocation7], 1 }
  0xd1   :  { %286 = vsyncpa [#allocation5], 1 }

</bundles_post_ra>
